<compile_context>
chip_gen: v6e
topology: v6e:2x2x1
jax: 0.10.0
libtpu: 0.0.40
codegen_flags: <defaults>
</compile_context>

<pallas_src>
import jax
import jax.numpy as jnp
from jax.experimental import pallas as pl
from jax.experimental.pallas import tpu as pltpu

IN_CHANNELS = 1
OUT_CHANNELS = 3
KERNEL_SIZE = 3
BN_EPS = 1e-5


def encoder_kernel(x_ref, w_ref, scale_ref, bias_ref, o_ref):
    """Fused conv1d + relu + folded-batchnorm kernel for one batch tile.

    x_ref     : (N_t, L_pad)           float32, VMEM (zero-padded past L)
    w_ref     : (C_out, K)             float32, SMEM (conv weight, C_in == 1)
    scale_ref : (C_out,)               float32, SMEM (gamma * rsqrt(var + eps))
    bias_ref  : (C_out,)               float32, SMEM (beta - mean * scale)
    o_ref     : (N_t, C_out * L_pad)   float32, VMEM (channel-major, 128-aligned)
    """
    n_t, l_pad = x_ref.shape
    x = x_ref[...]

    # Edge masks for the rolled taps (hoisted: JAX does not CSE broadcast_in_dim).
    lane = jax.lax.broadcasted_iota(jnp.int32, (n_t, l_pad), 1)
    first_lane = lane == 0
    last_lane = lane == (l_pad - 1)

    for c in range(OUT_CHANNELS):  # C_out == 3 -> static unroll
        # Centre tap.
        acc = x * w_ref[c, 1]
        # Left neighbour x[j-1]: XLU lane rotate, zero the wrapped lane-0 column
        # (reproduces F.pad's left zero). Only one shifted view is live at a time.
        prev = jnp.where(first_lane, 0.0, pltpu.roll(x, 1, axis=1))
        acc = acc + prev * w_ref[c, 0]
        # Right neighbour x[j+1]: rotate by l_pad-1 (== -1), zero the last lane.
        nxt = jnp.where(last_lane, 0.0, pltpu.roll(x, l_pad - 1, axis=1))
        acc = acc + nxt * w_ref[c, 2]
        # ReLU, then eval-mode BatchNorm folded into one FMA.
        acc = jnp.maximum(acc, 0.0) * scale_ref[c] + bias_ref[c]
        # Dropout(p=0.1) is identity at inference time.
        # TODO(synk): training-mode dropout (pltpu.prng_*) / batch-stat BN not implemented.
        # Lane-aligned dense store: c * l_pad is a multiple of 128.
        o_ref[:, c * l_pad:(c + 1) * l_pad] = acc


def _pick_batch_tile(n, l_pad):
    """Pick the batch-tile row count (multiple of 8, or full N when N <= 8).

    Per-step VMEM footprint ~= (2 input bufs * 4B + 2 output bufs * 12B +
    ~4 f32 tile-sized temporaries * 4B) = ~48 bytes per tile element.
    Budget ~12 MiB/step: fits v5e's 16 MiB scoped default with headroom and is
    comfortable on v7x's 64 MiB-per-TC VMEM (limit raised to 48 MiB below).
    The grid is cdiv-based, so any N works via a masked ragged last block; we
    also target >= 8 grid steps when N allows (pipelining + 2-TC sharding).
    """
    if n <= 8:
        return n  # block == full dim is always layout-legal
    budget_rows = max(8, ((12 << 20) // (48 * max(l_pad, 1))) // 8 * 8)
    step_rows = max(8, (pl.cdiv(n, 8) + 7) // 8 * 8)  # aim for ~8 grid steps
    return min(budget_rows, step_rows)
    # TODO(synk): add an L-axis grid dimension (halo via extra 128-lane block per
    # side) for the small-N / very-large-L regime where 8 rows already exceed budget.


def encoder_forward(x, w, gamma, beta, running_mean, running_var):
    """x: (N, 1, L) float32. Returns (N, C_out, L) float32 (PyTorch eval forward)."""
    N, c_in, L = x.shape
    assert c_in == IN_CHANNELS

    # Pad L to a multiple of 128 so each per-channel output slab starts on a
    # lane boundary (dense, unmasked stores). Zero padding also supplies the
    # right-hand conv halo at column L-1.
    L_pad = max(128, ((L + 127) // 128) * 128)
    x2d = jnp.reshape(x, (N, L)).astype(jnp.float32)
    if L_pad != L:
        x2d = jnp.pad(x2d, ((0, 0), (0, L_pad - L)))
    w2d = jnp.reshape(w, (OUT_CHANNELS, KERNEL_SIZE)).astype(jnp.float32)

    # Fold eval-mode BatchNorm into a per-channel scale/bias FMA.
    scale = (gamma.astype(jnp.float32)
             * jax.lax.rsqrt(running_var.astype(jnp.float32) + BN_EPS))
    bias = beta.astype(jnp.float32) - running_mean.astype(jnp.float32) * scale

    n_t = _pick_batch_tile(N, L_pad)
    grid = (pl.cdiv(N, n_t),)

    cost = pl.CostEstimate(
        flops=8 * OUT_CHANNELS * N * L_pad,              # 3 mul + 2 add + relu + BN FMA
        transcendentals=0,
        bytes_accessed=(1 + OUT_CHANNELS) * N * L_pad * 4,
    )

    out = pl.pallas_call(
        encoder_kernel,
        out_shape=jax.ShapeDtypeStruct((N, OUT_CHANNELS * L_pad), jnp.float32),
        grid=grid,
        in_specs=[
            pl.BlockSpec((n_t, L_pad), lambda i: (i, 0)),       # x tile (VMEM)
            pl.BlockSpec(memory_space=pltpu.MemorySpace.SMEM),  # conv weight
            pl.BlockSpec(memory_space=pltpu.MemorySpace.SMEM),  # BN scale
            pl.BlockSpec(memory_space=pltpu.MemorySpace.SMEM),  # BN bias
        ],
        out_specs=pl.BlockSpec((n_t, OUT_CHANNELS * L_pad), lambda i: (i, 0)),
        compiler_params=pltpu.CompilerParams(
            dimension_semantics=("parallel",),
            vmem_limit_bytes=48 * 1024 * 1024,
        ),
        cost_estimate=cost,
    )(x2d, w2d, scale, bias)

    # (N, C_out*L_pad) -> (N, C_out, L_pad): row-major metadata reshape.
    out = jnp.reshape(out, (N, OUT_CHANNELS, L_pad))
    if L_pad != L:
        out = out[:, :, :L]
    return out


def encoder_reference(x, w, gamma, beta, running_mean, running_var):
    """Pure-JAX reference matching the PyTorch eval forward."""
    pad = KERNEL_SIZE // 2
    xp = jnp.pad(x, ((0, 0), (0, 0), (pad, pad)))
    y = jax.lax.conv_general_dilated(
        xp, w, window_strides=(1,), padding="VALID",
        dimension_numbers=("NCH", "OIH", "NCH"))
    y = jnp.maximum(y, 0.0)
    inv_std = jax.lax.rsqrt(running_var + BN_EPS)
    y = ((y - running_mean[None, :, None]) * inv_std[None, :, None]
         * gamma[None, :, None] + beta[None, :, None])
    return y


if __name__ == "__main__":
    key = jax.random.PRNGKey(0)
    k_x, k_w, k_g, k_b, k_m, k_v = jax.random.split(key, 6)

    N, L = 2, 16
    x = jax.random.normal(k_x, (N, IN_CHANNELS, L), dtype=jnp.float32)

    # Synthetic parameters: Conv1d weight (C_out, C_in, K), BN params (C_out,).
    w = 0.5 * jax.random.normal(k_w, (OUT_CHANNELS, IN_CHANNELS, KERNEL_SIZE), dtype=jnp.float32)
    gamma = 1.0 + 0.1 * jax.random.normal(k_g, (OUT_CHANNELS,), dtype=jnp.float32)
    beta = 0.1 * jax.random.normal(k_b, (OUT_CHANNELS,), dtype=jnp.float32)
    running_mean = 0.1 * jax.random.normal(k_m, (OUT_CHANNELS,), dtype=jnp.float32)
    running_var = jnp.abs(jax.random.normal(k_v, (OUT_CHANNELS,), dtype=jnp.float32)) + 0.5

    out = encoder_forward(x, w, gamma, beta, running_mean, running_var)
    out = jax.block_until_ready(out)

    ref = encoder_reference(x, w, gamma, beta, running_mean, running_var)
    assert out.shape == (N, OUT_CHANNELS, L), out.shape
    assert jnp.allclose(out, ref, atol=1e-5, rtol=1e-5), float(jnp.max(jnp.abs(out - ref)))

    print("KERNEL_OK")
</pallas_src>

<mosaic_0001>
module attributes {stable_mosaic.version = 11 : i64} {
  func.func @encoder_kernel(%arg0: i32, %arg1: memref<2x128xf32, #tpu.memory_space<vmem>>, %arg2: memref<3x3xf32, #tpu.memory_space<smem>>, %arg3: memref<3xf32, #tpu.memory_space<smem>>, %arg4: memref<3xf32, #tpu.memory_space<smem>>, %arg5: memref<2x384xf32, #tpu.memory_space<vmem>>) attributes {dimension_semantics = [#tpu.dimension_semantics<parallel>], iteration_bounds = array<i64: 1>, scalar_prefetch = 0 : i64, scratch_operands = 0 : i64, tpu.core_type = #tpu.core_type<tc>, window_params = [{transform_indices = @transform_0, window_bounds = array<i64: 2, 128>}, {transform_indices = @transform_1, window_bounds = array<i64: 3, 3>}, {transform_indices = @transform_2, window_bounds = array<i64: 3>}, {transform_indices = @transform_3, window_bounds = array<i64: 3>}, {transform_indices = @transform_4, window_bounds = array<i64: 2, 384>}]} {
    %c0 = arith.constant 0 : index
    %c0_0 = arith.constant 0 : index
    %0 = vector.load %arg1[%c0, %c0_0] : memref<2x128xf32, #tpu.memory_space<vmem>>, vector<2x128xf32>
    %1 = tpu.iota {dimensions = array<i32: 1>} : vector<2x128xi32>
    %c0_i32 = arith.constant 0 : i32
    %2 = vector.broadcast %c0_i32 : i32 to vector<2x128xi32>
    %3 = arith.cmpi eq, %1, %2 : vector<2x128xi32>
    %c127_i32 = arith.constant 127 : i32
    %4 = vector.broadcast %c127_i32 : i32 to vector<2x128xi32>
    %5 = arith.cmpi eq, %1, %4 : vector<2x128xi32>
    %c0_1 = arith.constant 0 : index
    %c1 = arith.constant 1 : index
    %6 = memref.load %arg2[%c0_1, %c1] : memref<3x3xf32, #tpu.memory_space<smem>>
    %7 = vector.broadcast %6 : f32 to vector<2x128xf32>
    %8 = arith.mulf %0, %7 : vector<2x128xf32>
    %c1_i32 = arith.constant 1 : i32
    %9 = tpu.dynamic_rotate %0 by %c1_i32 dim 1 : vector<2x128xf32>, i32 -> vector<2x128xf32>
    %cst = arith.constant 0.000000e+00 : f32
    %10 = vector.broadcast %cst : f32 to vector<2x128xf32>
    %11 = arith.select %3, %10, %9 : vector<2x128xi1>, vector<2x128xf32>
    %c0_2 = arith.constant 0 : index
    %c0_3 = arith.constant 0 : index
    %12 = memref.load %arg2[%c0_2, %c0_3] : memref<3x3xf32, #tpu.memory_space<smem>>
    %13 = vector.broadcast %12 : f32 to vector<2x128xf32>
    %14 = arith.mulf %11, %13 : vector<2x128xf32>
    %15 = arith.addf %8, %14 : vector<2x128xf32>
    %c127_i32_4 = arith.constant 127 : i32
    %16 = tpu.dynamic_rotate %0 by %c127_i32_4 dim 1 : vector<2x128xf32>, i32 -> vector<2x128xf32>
    %cst_5 = arith.constant 0.000000e+00 : f32
    %17 = vector.broadcast %cst_5 : f32 to vector<2x128xf32>
    %18 = arith.select %5, %17, %16 : vector<2x128xi1>, vector<2x128xf32>
    %c0_6 = arith.constant 0 : index
    %c2 = arith.constant 2 : index
    %19 = memref.load %arg2[%c0_6, %c2] : memref<3x3xf32, #tpu.memory_space<smem>>
    %20 = vector.broadcast %19 : f32 to vector<2x128xf32>
    %21 = arith.mulf %18, %20 : vector<2x128xf32>
    %22 = arith.addf %15, %21 : vector<2x128xf32>
    %cst_7 = arith.constant 0.000000e+00 : f32
    %23 = vector.broadcast %cst_7 : f32 to vector<2x128xf32>
    %24 = arith.maximumf %22, %23 : vector<2x128xf32>
    %c0_8 = arith.constant 0 : index
    %25 = memref.load %arg3[%c0_8] : memref<3xf32, #tpu.memory_space<smem>>
    %26 = vector.broadcast %25 : f32 to vector<2x128xf32>
    %27 = arith.mulf %24, %26 : vector<2x128xf32>
    %c0_9 = arith.constant 0 : index
    %28 = memref.load %arg4[%c0_9] : memref<3xf32, #tpu.memory_space<smem>>
    %29 = vector.broadcast %28 : f32 to vector<2x128xf32>
    %30 = arith.addf %27, %29 : vector<2x128xf32>
    %c0_10 = arith.constant 0 : index
    %c0_11 = arith.constant 0 : index
    %31 = vector.load %arg5[%c0_10, %c0_11] : memref<2x384xf32, #tpu.memory_space<vmem>>, vector<2x128xf32>
    tpu.vector_store %arg5[%c0_10, %c0_11], %30 {strides = array<i32>} : memref<2x384xf32, #tpu.memory_space<vmem>>, vector<2x128xf32>,
    %c1_12 = arith.constant 1 : index
    %c1_13 = arith.constant 1 : index
    %32 = memref.load %arg2[%c1_12, %c1_13] : memref<3x3xf32, #tpu.memory_space<smem>>
    %33 = vector.broadcast %32 : f32 to vector<2x128xf32>
    %34 = arith.mulf %0, %33 : vector<2x128xf32>
    %c1_i32_14 = arith.constant 1 : i32
    %35 = tpu.dynamic_rotate %0 by %c1_i32_14 dim 1 : vector<2x128xf32>, i32 -> vector<2x128xf32>
    %cst_15 = arith.constant 0.000000e+00 : f32
    %36 = vector.broadcast %cst_15 : f32 to vector<2x128xf32>
    %37 = arith.select %3, %36, %35 : vector<2x128xi1>, vector<2x128xf32>
    %c1_16 = arith.constant 1 : index
    %c0_17 = arith.constant 0 : index
    %38 = memref.load %arg2[%c1_16, %c0_17] : memref<3x3xf32, #tpu.memory_space<smem>>
    %39 = vector.broadcast %38 : f32 to vector<2x128xf32>
    %40 = arith.mulf %37, %39 : vector<2x128xf32>
    %41 = arith.addf %34, %40 : vector<2x128xf32>
    %c127_i32_18 = arith.constant 127 : i32
    %42 = tpu.dynamic_rotate %0 by %c127_i32_18 dim 1 : vector<2x128xf32>, i32 -> vector<2x128xf32>
    %cst_19 = arith.constant 0.000000e+00 : f32
    %43 = vector.broadcast %cst_19 : f32 to vector<2x128xf32>
    %44 = arith.select %5, %43, %42 : vector<2x128xi1>, vector<2x128xf32>
    %c1_20 = arith.constant 1 : index
    %c2_21 = arith.constant 2 : index
    %45 = memref.load %arg2[%c1_20, %c2_21] : memref<3x3xf32, #tpu.memory_space<smem>>
    %46 = vector.broadcast %45 : f32 to vector<2x128xf32>
    %47 = arith.mulf %44, %46 : vector<2x128xf32>
    %48 = arith.addf %41, %47 : vector<2x128xf32>
    %cst_22 = arith.constant 0.000000e+00 : f32
    %49 = vector.broadcast %cst_22 : f32 to vector<2x128xf32>
    %50 = arith.maximumf %48, %49 : vector<2x128xf32>
    %c1_23 = arith.constant 1 : index
    %51 = memref.load %arg3[%c1_23] : memref<3xf32, #tpu.memory_space<smem>>
    %52 = vector.broadcast %51 : f32 to vector<2x128xf32>
    %53 = arith.mulf %50, %52 : vector<2x128xf32>
    %c1_24 = arith.constant 1 : index
    %54 = memref.load %arg4[%c1_24] : memref<3xf32, #tpu.memory_space<smem>>
    %55 = vector.broadcast %54 : f32 to vector<2x128xf32>
    %56 = arith.addf %53, %55 : vector<2x128xf32>
    %c0_25 = arith.constant 0 : index
    %c128 = arith.constant 128 : index
    %57 = vector.load %arg5[%c0_25, %c128] : memref<2x384xf32, #tpu.memory_space<vmem>>, vector<2x128xf32>
    tpu.vector_store %arg5[%c0_25, %c128], %56 {strides = array<i32>} : memref<2x384xf32, #tpu.memory_space<vmem>>, vector<2x128xf32>,
    %c2_26 = arith.constant 2 : index
    %c1_27 = arith.constant 1 : index
    %58 = memref.load %arg2[%c2_26, %c1_27] : memref<3x3xf32, #tpu.memory_space<smem>>
    %59 = vector.broadcast %58 : f32 to vector<2x128xf32>
    %60 = arith.mulf %0, %59 : vector<2x128xf32>
    %c1_i32_28 = arith.constant 1 : i32
    %61 = tpu.dynamic_rotate %0 by %c1_i32_28 dim 1 : vector<2x128xf32>, i32 -> vector<2x128xf32>
    %cst_29 = arith.constant 0.000000e+00 : f32
    %62 = vector.broadcast %cst_29 : f32 to vector<2x128xf32>
    %63 = arith.select %3, %62, %61 : vector<2x128xi1>, vector<2x128xf32>
    %c2_30 = arith.constant 2 : index
    %c0_31 = arith.constant 0 : index
    %64 = memref.load %arg2[%c2_30, %c0_31] : memref<3x3xf32, #tpu.memory_space<smem>>
    %65 = vector.broadcast %64 : f32 to vector<2x128xf32>
    %66 = arith.mulf %63, %65 : vector<2x128xf32>
    %67 = arith.addf %60, %66 : vector<2x128xf32>
    %c127_i32_32 = arith.constant 127 : i32
    %68 = tpu.dynamic_rotate %0 by %c127_i32_32 dim 1 : vector<2x128xf32>, i32 -> vector<2x128xf32>
    %cst_33 = arith.constant 0.000000e+00 : f32
    %69 = vector.broadcast %cst_33 : f32 to vector<2x128xf32>
    %70 = arith.select %5, %69, %68 : vector<2x128xi1>, vector<2x128xf32>
    %c2_34 = arith.constant 2 : index
    %c2_35 = arith.constant 2 : index
    %71 = memref.load %arg2[%c2_34, %c2_35] : memref<3x3xf32, #tpu.memory_space<smem>>
    %72 = vector.broadcast %71 : f32 to vector<2x128xf32>
    %73 = arith.mulf %70, %72 : vector<2x128xf32>
    %74 = arith.addf %67, %73 : vector<2x128xf32>
    %cst_36 = arith.constant 0.000000e+00 : f32
    %75 = vector.broadcast %cst_36 : f32 to vector<2x128xf32>
    %76 = arith.maximumf %74, %75 : vector<2x128xf32>
    %c2_37 = arith.constant 2 : index
    %77 = memref.load %arg3[%c2_37] : memref<3xf32, #tpu.memory_space<smem>>
    %78 = vector.broadcast %77 : f32 to vector<2x128xf32>
    %79 = arith.mulf %76, %78 : vector<2x128xf32>
    %c2_38 = arith.constant 2 : index
    %80 = memref.load %arg4[%c2_38] : memref<3xf32, #tpu.memory_space<smem>>
    %81 = vector.broadcast %80 : f32 to vector<2x128xf32>
    %82 = arith.addf %79, %81 : vector<2x128xf32>
    %c0_39 = arith.constant 0 : index
    %c256 = arith.constant 256 : index
    %83 = vector.load %arg5[%c0_39, %c256] : memref<2x384xf32, #tpu.memory_space<vmem>>, vector<2x128xf32>
    tpu.vector_store %arg5[%c0_39, %c256], %82 {strides = array<i32>} : memref<2x384xf32, #tpu.memory_space<vmem>>, vector<2x128xf32>,
    return
  }
  func.func @transform_0(%arg0: i32) -> (i32, i32) {
    %c0_i32 = arith.constant 0 : i32
    %c0_i32_0 = arith.constant 0 : i32
    return %arg0, %c0_i32 : i32, i32
  }
  func.func @transform_1(%arg0: i32) -> (i32, i32) {
    %c0_i32 = arith.constant 0 : i32
    %c0_i32_0 = arith.constant 0 : i32
    %c0_i32_1 = arith.constant 0 : i32
    return %c0_i32, %c0_i32_0 : i32, i32
  }
  func.func @transform_2(%arg0: i32) -> i32 {
    %c0_i32 = arith.constant 0 : i32
    %c0_i32_0 = arith.constant 0 : i32
    return %c0_i32 : i32
  }
  func.func @transform_3(%arg0: i32) -> i32 {
    %c0_i32 = arith.constant 0 : i32
    %c0_i32_0 = arith.constant 0 : i32
    return %c0_i32 : i32
  }
  func.func @transform_4(%arg0: i32) -> (i32, i32) {
    %c0_i32 = arith.constant 0 : i32
    %c0_i32_0 = arith.constant 0 : i32
    return %arg0, %c0_i32 : i32, i32
  }
}

</mosaic_0001>

<bundles_post_ra>
// kernel: tpu_custom_call.1
= control target key start
LH: loop header
LB: loop body
LE: loop exit
PB: predicated region body
PF: predicated region fallthrough
CT: control target
= control target key end

     0   :  { %9 = vsyncpa [#allocation3], 0  ;;  %s323_s0 = inlined_call_operand.hbm [shape: f32[2,128], index: 0, kind: input, shape index: {}]   ;;  %s324_s1 = inlined_call_operand.hbm [shape: f32[3,3], index: 1, kind: input, shape index: {}]   ;;  %s325_s2 = inlined_call_operand.vmem [shape: f32[3], index: 2, kind: input, shape index: {}]   ;;  %s326_s3 = inlined_call_operand.vmem [shape: f32[3], index: 3, kind: input, shape index: {}]   ;;  %s327_s4 = inlined_call_operand.hbm [shape: f32[2,384], index: 4, kind: output, shape index: {}]  }
   0x1   :  { %10 = vsyncpa [#allocation5], 0 }
   0x2   :  { %11 = vsyncpa [#allocation6], 0 }
   0x3   :  { %12 = vsyncpa [#allocation10], 0 }
   0x4   :  { %13 = vsyncpa [#allocation4], 0  ;;  %s252_s15 = smov [#allocation2]   ;;  %s38_s19 = sshll.u32 %s325_s2, 4  ;;  %s39_s19 = int_to_ptr.vmem [resolvable:$true] %s38_s19 }
   0x5   :  { %s20_s16 = sshll.u32 %s252_s15, 4  ;;  %s21_s16 = int_to_ptr.vmem [resolvable:$true] %s20_s16 }
   0x6   :  { %s178_s20 = scalar_lea.vmem %s21_s16, 32  ;;  %p183_p1 = scmp.lt.s32.totalorder %s21_s16, %s21_s16 }
   0x7   :  { %p179_p0 = scmp.ne.s32.totalorder %s21_s16, %s178_s20  ;;  %p184_p2 = scmp.lt.s32.totalorder %s178_s20, %s178_s20 }
   0x9   :  { %p185_p3 = por %p184_p2, %p183_p1 }
   0xb   :  { %p186_p4 = pnand %p185_p3, %p179_p0 }
   0xd   :  { %189 = shalt.err (!%p186_p4)
}
   0xe   :  { %23 = dma.hbm_to_vmem [thread:$0]  %s323_s0, 32, %s21_s16, [#allocation3]  }
   0xf   :  { %s253_s23 = smov [#allocation7]   ;;  %s48_s27 = sshll.u32 %s326_s3, 4  ;;  %s49_s27 = int_to_ptr.vmem [resolvable:$true] %s48_s27 }
  0x10   :  { %31 = dma.hbm_to_smem %s324_s1, 64, %s253_s23, [#allocation5]  }
  0x11   :  { %s198_s28 = scalar_lea.vmem %s39_s19, 16  ;;  %p203_p6 = scmp.lt.s32.totalorder %s39_s19, %s39_s19 }
  0x12   :  { %p199_p5 = scmp.ne.s32.totalorder %s39_s19, %s198_s28  ;;  %p204_p7 = scmp.lt.s32.totalorder %s198_s28, %s198_s28 }
  0x14   :  { %p205_p8 = por %p204_p7, %p203_p6 }
  0x16   :  { %p206_p9 = pnand %p205_p8, %p199_p5 }
  0x18   :  { %209 = shalt.err (!%p206_p9)
}
  0x19   :  { %s254_s29 = smov [#allocation8]   ;;  %s210_s0 = scalar_lea.vmem %s49_s27, 16 }
  0x1a   :  { %41 = dma.vmem_to_smem %s39_s19, 16, %s254_s29, [#allocation6]  }
  0x1b   :  { %p211_p10 = scmp.ne.s32.totalorder %s49_s27, %s210_s0  ;;  %p215_p11 = scmp.lt.s32.totalorder %s49_s27, %s49_s27 }
  0x1c   :  { %p216_p12 = scmp.lt.s32.totalorder %s210_s0, %s210_s0 }
  0x1e   :  { %p217_p13 = por %p216_p12, %p215_p11 }
  0x20   :  { %p218_p0 = pnand %p217_p13, %p211_p10 }
  0x22   :  { %221 = shalt.err (!%p218_p0)
}
  0x23   :  { %s255_s1 = smov [#allocation9]  }
  0x24   :  { %51 = dma.vmem_to_smem %s49_s27, 16, %s255_s1, [#allocation10]  }
  0x25   :  { %242 = dma.done.wait [#allocation3], 32  }
  0x26   :  { %243 = vsyncadd [#allocation3], 4294967264 }
  0x27   :  { %244 = dma.done.wait [#allocation5], 64  }
  0x28   :  { %245 = vsyncadd [#allocation5], 4294967232 }
  0x29   :  { %246 = dma.done.wait [#allocation6], 16  }
  0x2a   :  { %247 = vsyncadd [#allocation6], 4294967280 }
  0x2b   :  { %248 = dma.done.wait [#allocation10], 16  }
  0x2c   :  { %249 = vsyncadd [#allocation10], 4294967280 }
  0x2d   :  { %64 = sfence }
  0x2e   :  { %v65_v0 = vld [vmem:[#allocation2] sm:$0x3]  ;;  %s256_s3 = smov 1   ;;  %s257_s30 = smov 127   ;;  %v66_v1 = vlaneseq }
  0x2f   :  { %73 = vrot.lane.b32.xlu0 %v65_v0, %s256_s3  ;;  %s151_s5 = sld [smem:[#allocation7 + $0x1]]  ;;  %s258_s20 = smov [#allocation11]  }
  0x30   :  { %s76_s6 = sld [smem:[#allocation7]]  ;;  %v67_v2 = vand.u32 127, %v66_v1  ;;  %s139_s21 = sshll.u32 %s258_s20, 4  ;;  %s140_s21 = int_to_ptr.vmem [resolvable:$true] %s139_s21 }
  0x31   :  { %s153_s7 = sld [smem:[#allocation7 + $0x81]]  ;;  %s222_s22 = scalar_lea.vmem %s140_s21, 96 }
  0x32   :  { %s154_s8 = sld [smem:[#allocation7 + $0x80]]  ;;  %vm68_vm0 = vcmp.eq.s32.totalorder %v67_v2, 0  ;;  %vm69_vm1 = vcmp.eq.s32.totalorder %v67_v2, 127  ;;  %p223_p1 = scmp.ne.s32.totalorder %s140_s21, %s222_s22 }
  0x33   :  { %80 = vrot.lane.b32.xlu0 %v65_v0, %s257_s30  ;;  %s158_s9 = sld [smem:[#allocation7 + $0x101]]  ;;  %p227_p2 = scmp.lt.s32.totalorder %s140_s21, %s140_s21 }
  0x34   :  { %s159_s10 = sld [smem:[#allocation7 + $0x100]]  ;;  %p228_p3 = scmp.lt.s32.totalorder %s222_s22, %s222_s22 }
  0x35   :  { %s296_s11 = sld [smem:[#allocation7 + $0x2]]  ;;  %v71_v3 = vstv %s151_s5 }
  0x36   :  { %s298_s12 = sld [smem:[#allocation7 + $0x82]]  ;;  %v77_v5 = vstv %s76_s6  ;;  %v72_v10 = vmul.f32 %v71_v3, %v65_v0  ;;  %p229_p4 = por %p228_p3, %p227_p2 }
  0x37   :  { %s300_s13 = sld [smem:[#allocation7 + $0x102]]  ;;  %v96_v4 = vstv %s153_s7 }
  0x38   :  { %s302_s14 = sld [smem:[#allocation8]]  ;;  %v99_v6 = vstv %s154_s8  ;;  %v97_v12 = vmul.f32 %v96_v4, %v65_v0  ;;  %p230_p5 = pnand %p229_p4, %p223_p1 }
  0x39   :  { %v115_v7 = vstv %s158_s9  ;;  %s304_s15 = sld [smem:[#allocation9]] }
  0x3a   :  { %v118_v8 = vstv %s159_s10  ;;  %s306_s16 = sld [smem:[#allocation8 + $0x1]]  ;;  %v116_v15 = vmul.f32 %v115_v7, %v65_v0 }
  0x3b   :  { %s308_s17 = sld [smem:[#allocation8 + $0x2]]  ;;  %v84_v17 = vstv %s296_s11 }
  0x3c   :  { %s310_s18 = sld [smem:[#allocation9 + $0x1]]  ;;  %v103_v18 = vstv %s298_s12 }
  0x3d   :  { %v122_v19 = vstv %s300_s13  ;;  %s162_s19 = sld [smem:[#allocation9 + $0x2]] }
  0x3e   :  { %v89_v31 = vstv %s302_s14 }
  0x3f   :  { %v92_v37 = vstv %s304_s15 }
  0x40   :  { %v108_v32 = vstv %s306_s16 }
  0x41   :  { %v127_v33 = vstv %s308_s17 }
  0x42   :  { %v111_v38 = vstv %s310_s18 }
  0x43   :  { %v130_v39 = vstv %s162_s19 }
  0xa1   :  { %v74_v9 = vpop.permute.xlu0 %73 }
  0xa2   :  { %v75_v11 = vsel %vm68_vm0, 0.0, %v74_v9 }
  0xa3   :  { %v78_v13 = vmul.f32 %v77_v5, %v75_v11  ;;  %v100_v14 = vmul.f32 %v99_v6, %v75_v11  ;;  %v119_v16 = vmul.f32 %v118_v8, %v75_v11 }
  0xa5   :  { %v81_v20 = vpop.permute.xlu0 %80  ;;  %v79_v21 = vadd.f32 %v78_v13, %v72_v10  ;;  %v101_v22 = vadd.f32 %v100_v14, %v97_v12  ;;  %v120_v24 = vadd.f32 %v119_v16, %v116_v15 }
  0xa6   :  { %v82_v23 = vsel %vm69_vm1, 0.0, %v81_v20 }
  0xa7   :  { %v85_v25 = vmul.f32 %v84_v17, %v82_v23  ;;  %v104_v26 = vmul.f32 %v103_v18, %v82_v23  ;;  %v123_v27 = vmul.f32 %v122_v19, %v82_v23 }
  0xa9   :  { %v86_v28 = vadd.f32 %v85_v25, %v79_v21  ;;  %v105_v29 = vadd.f32 %v104_v26, %v101_v22  ;;  %v124_v30 = vadd.f32 %v123_v27, %v120_v24 }
  0xab   :  { %v87_v34 = vmax.f32 %v86_v28, 0.0  ;;  %v106_v35 = vmax.f32 %v105_v29, 0.0  ;;  %v125_v36 = vmax.f32 %v124_v30, 0.0 }
  0xad   :  { %v90_v40 = vmul.f32 %v89_v31, %v87_v34  ;;  %v109_v41 = vmul.f32 %v108_v32, %v106_v35  ;;  %v128_v42 = vmul.f32 %v127_v33, %v125_v36 }
  0xaf   :  { %v93_v43 = vadd.f32 %v92_v37, %v90_v40  ;;  %v112_v44 = vadd.f32 %v111_v38, %v109_v41  ;;  %v131_v45 = vadd.f32 %v130_v39, %v128_v42 }
  0xb1   :  { %94 = vst [vmem:[#allocation11] sm:$0x3] %v93_v43  ;;  %113 = vst [vmem:[#allocation11 + $0x2] sm:$0x3] %v112_v44 }
  0xb2   :  { %132 = vst [vmem:[#allocation11 + $0x4] sm:$0x3] %v131_v45 }
  0xb3   :  { %233 = shalt.err (!%p230_p5)
}
  0xb4   :  { %142 = dma.vmem_to_hbm [thread:$0]  %s140_s21, 96, %s327_s4, [#allocation4]  }
  0xb5   :  { %250 = dma.done.wait [#allocation4], 96  }
  0xb6   :  { %251 = vsyncadd [#allocation4], 4294967200 }
  0xb7   :  { %146 = vsyncpa [#allocation3], 1 }
  0xb8   :  { %147 = vsyncpa [#allocation4], 1 }
  0xb9   :  { %148 = vsyncpa [#allocation5], 1 }
  0xba   :  { %149 = vsyncpa [#allocation6], 1 }
  0xbb   :  { %150 = vsyncpa [#allocation10], 1 }

</bundles_post_ra>
